<compile_context>
chip_gen: v6e
topology: v6e:2x2x1
jax: 0.10.0
libtpu: 0.0.40
codegen_flags: <defaults>
</compile_context>

<pallas_src>
import jax
import jax.numpy as jnp
from jax.experimental import pallas as pl
from jax.experimental.pallas import tpu as pltpu


# ----------------------------------------------------------------------------
# Kernel
# ----------------------------------------------------------------------------
def make_denoise_kernel(compute_dtype):
    def kernel(x_ref, a1_ref, b1_ref, a2_ref, b2_ref, w3_ref, b3_ref,
               out_ref, flat_ref):
        # conv1 (+ReLU) as one dense matmul over the receptive-field matrix.
        h1 = jnp.dot(x_ref[...].astype(compute_dtype), a1_ref[...],
                     preferred_element_type=jnp.float32)
        h1 = jnp.maximum(h1 + b1_ref[...], 0.0)            # (Bt, K1pad) f32

        # conv2 (+ReLU); A2's columns are channel-major (c*L2 + l2),
        # i.e. exactly PyTorch's x.view(B, -1) order.
        h2 = jnp.dot(h1.astype(compute_dtype), a2_ref[...],
                     preferred_element_type=jnp.float32)
        h2 = jnp.maximum(h2 + b2_ref[...], 0.0)            # (Bt, n_flat) f32

        # Second output: the exact f32 activations (no identity-matmul rounding).
        flat_ref[...] = h2.astype(flat_ref.dtype)

        # Linear head.
        out_ref[...] = (jnp.dot(h2.astype(compute_dtype), w3_ref[...],
                                preferred_element_type=jnp.float32)
                        + b3_ref[...]).astype(out_ref.dtype)

    return kernel


# ----------------------------------------------------------------------------
# Host-side helpers
# ----------------------------------------------------------------------------
def _round_up(a, m):
    return (a + m - 1) // m * m


def _num_tensorcores():
    """Best-effort TensorCore count per chip; falls back to 1 (always safe)."""
    try:
        n = getattr(jax.devices()[0], "num_cores", None)
        if not n:
            n = getattr(pltpu.get_tpu_info(), "num_cores", 1)
        return max(1, int(n))
    except Exception:
        return 1


def _choose_b_tile(B, n_cores):
    """Large batch tiles to amortize the ~0.35us/step overhead; only split a
    single-tile batch when the chip actually has >1 TensorCore and the batch is
    big enough that the split is not pure serial overhead."""
    Bp = _round_up(max(B, 1), 8)
    bt = min(2048, Bp)
    if n_cores > 1 and Bp >= 1024 and pl.cdiv(Bp, bt) < n_cores:
        bt = _round_up(pl.cdiv(Bp, n_cores), 8)
    return bt


def _build_dense_weights(params, T, compute_dtype):
    """Fold the two VALID conv1d's and the Linear head into dense matrices.
    The hidden width L1*feat1 is zero-padded to a multiple of 128."""
    (w1, b1), (w2, b2), (wout, bout) = params
    feat1, _, size1 = w1.shape
    feat2, _, size2 = w2.shape
    spike_size = wout.shape[0]
    L1 = T - size1 + 1
    L2 = L1 - size2 + 1
    K1 = L1 * feat1
    n_flat = feat2 * L2
    K1p = _round_up(K1, 128)

    # A1[t, l*feat1 + f] = w1[f, 0, t-l]  (0 <= t-l < size1)
    t_idx = jnp.arange(T)[:, None]
    l_idx = jnp.arange(L1)[None, :]
    k1 = t_idx - l_idx                                            # (T, L1)
    valid1 = (k1 >= 0) & (k1 < size1)
    w1_kf = jnp.transpose(w1[:, 0, :], (1, 0))                    # (size1, feat1)
    A1 = jnp.where(valid1[:, :, None],
                   w1_kf[jnp.clip(k1, 0, size1 - 1)],
                   0.0).reshape(T, K1)
    b1r = jnp.broadcast_to(b1[None, :], (L1, feat1)).reshape(1, K1)
    A1 = jnp.pad(A1, ((0, 0), (0, K1p - K1)))
    b1r = jnp.pad(b1r, ((0, 0), (0, K1p - K1)))                   # padded cols -> relu(0)=0

    # A2[(l1*feat1+f), (c*L2+l2)] = w2[c, f, l1-l2]  (0 <= l1-l2 < size2)
    l1_idx = jnp.arange(L1)[:, None]
    l2_idx = jnp.arange(L2)[None, :]
    k2 = l1_idx - l2_idx                                          # (L1, L2)
    valid2 = (k2 >= 0) & (k2 < size2)
    w2_kfc = jnp.transpose(w2, (2, 1, 0))                         # (size2, feat1, feat2)
    gath = jnp.transpose(w2_kfc[jnp.clip(k2, 0, size2 - 1)], (0, 2, 3, 1))
    A2 = jnp.where(valid2[:, None, None, :], gath, 0.0).reshape(K1, n_flat)
    A2 = jnp.pad(A2, ((0, K1p - K1), (0, 0)))                     # zero rows for padded h1 cols
    b2r = jnp.broadcast_to(b2[:, None], (feat2, L2)).reshape(1, n_flat)

    W3 = jnp.transpose(wout, (1, 0))                              # (n_flat, spike_size)
    b3 = bout.reshape(1, spike_size)

    A1 = A1.astype(compute_dtype)
    A2 = A2.astype(compute_dtype)
    W3 = W3.astype(compute_dtype)
    return (A1, b1r, A2, b2r, W3, b3), (spike_size, n_flat)


# ----------------------------------------------------------------------------
# Public entry point
# ----------------------------------------------------------------------------
def denoise_forward(x, params, *, b_tile=None, compute_dtype=jnp.bfloat16,
                    out_dtype=jnp.float32):
    """x: (B, spike_size) f32. params in PyTorch layouts. Returns (out, x_flat)."""
    B, T = x.shape
    (A1, b1r, A2, b2r, W3, b3), (spike_size, n_flat) = \
        _build_dense_weights(params, T, compute_dtype)

    n_cores = _num_tensorcores()
    bt = b_tile if b_tile is not None else _choose_b_tile(B, n_cores)
    grid = pl.cdiv(max(B, 1), bt)
    B_pad = grid * bt
    xp = x if B_pad == B else jnp.pad(x, ((0, B_pad - B), (0, 0)))

    kernel = make_denoise_kernel(compute_dtype)
    const_spec = lambda arr: pl.BlockSpec(arr.shape, lambda i: (0, 0))

    out, flat = pl.pallas_call(
        kernel,
        out_shape=(jax.ShapeDtypeStruct((B_pad, spike_size), out_dtype),
                   jax.ShapeDtypeStruct((B_pad, n_flat), out_dtype)),
        grid_spec=pltpu.PrefetchScalarGridSpec(
            num_scalar_prefetch=0,
            grid=(grid,),
            in_specs=[pl.BlockSpec((bt, T), lambda i: (i, 0)),
                      const_spec(A1), const_spec(b1r),
                      const_spec(A2), const_spec(b2r),
                      const_spec(W3), const_spec(b3)],
            out_specs=[pl.BlockSpec((bt, spike_size), lambda i: (i, 0)),
                       pl.BlockSpec((bt, n_flat), lambda i: (i, 0))]),
        compiler_params=pltpu.CompilerParams(
            dimension_semantics=("parallel",),
            vmem_limit_bytes=32 * 1024 * 1024),
    )(xp, A1, b1r, A2, b2r, W3, b3)

    return out[:B], flat[:B]


# ----------------------------------------------------------------------------
# Pure-JAX reference reproducing the PyTorch forward exactly
# ----------------------------------------------------------------------------
def ref_forward(x, params):
    (w1, b1), (w2, b2), (wout, bout) = params
    dn = ('NCH', 'OIH', 'NCH')
    h = x[:, None, :]                                             # (B, 1, T)
    h = jax.lax.conv_general_dilated(h, w1, (1,), 'VALID', dimension_numbers=dn)
    h = jnp.maximum(h + b1[None, :, None], 0.0)
    h = jax.lax.conv_general_dilated(h, w2, (1,), 'VALID', dimension_numbers=dn)
    h = jnp.maximum(h + b2[None, :, None], 0.0)
    flat = h.reshape(h.shape[0], -1)                              # channel-major flatten
    out = flat @ wout.T + bout
    return out, flat


if __name__ == "__main__":
    # Small shapes consistent with Denoise(n_filters, filter_sizes, spike_size)
    n_filters = (8, 4, 4)        # (feat1, feat2, feat3); feat3 / conv3 unused in forward
    filter_sizes = (5, 5, 3)
    spike_size = 32
    B = 16

    feat1, feat2, _ = n_filters
    size1, size2, _ = filter_sizes
    L2 = spike_size - size1 - size2 + 2
    n_input_feat = feat2 * L2

    key = jax.random.PRNGKey(0)
    ks = jax.random.split(key, 7)
    s = 0.1
    w1 = s * jax.random.normal(ks[0], (feat1, 1, size1), jnp.float32)      # Conv1d weight (O, I, K)
    b1 = s * jax.random.normal(ks[1], (feat1,), jnp.float32)
    w2 = s * jax.random.normal(ks[2], (feat2, feat1, size2), jnp.float32)
    b2 = s * jax.random.normal(ks[3], (feat2,), jnp.float32)
    wout = s * jax.random.normal(ks[4], (spike_size, n_input_feat), jnp.float32)  # Linear weight
    bout = s * jax.random.normal(ks[5], (spike_size,), jnp.float32)
    x = jax.random.normal(ks[6], (B, spike_size), jnp.float32)

    params = ((w1, b1), (w2, b2), (wout, bout))
    out_ref, flat_ref = ref_forward(x, params)

    # 1) Default path: bf16 MXU operands, f32 accumulation (loose tolerance).
    out_bf, flat_bf = jax.block_until_ready(denoise_forward(x, params))
    assert out_bf.shape == (B, spike_size) and flat_bf.shape == (B, n_input_feat)
    assert jnp.allclose(out_bf, out_ref, atol=2e-2, rtol=2e-2)
    assert jnp.allclose(flat_bf, flat_ref, atol=2e-2, rtol=2e-2)

    # 2) Exact path: f32 operands (tight tolerance).
    out_f32, flat_f32 = jax.block_until_ready(
        denoise_forward(x, params, compute_dtype=jnp.float32))
    assert jnp.allclose(out_f32, out_ref, atol=1e-4, rtol=1e-4)
    assert jnp.allclose(flat_f32, flat_ref, atol=1e-4, rtol=1e-4)

    # 3) Multi-step grid path (b_tile override) to exercise batch tiling.
    out_g, flat_g = jax.block_until_ready(
        denoise_forward(x, params, b_tile=8, compute_dtype=jnp.float32))
    assert jnp.allclose(out_g, out_ref, atol=1e-4, rtol=1e-4)
    assert jnp.allclose(flat_g, flat_ref, atol=1e-4, rtol=1e-4)

    print("KERNEL_OK")
</pallas_src>

<mosaic_0001>
module attributes {stable_mosaic.version = 11 : i64} {
  func.func @kernel(%arg0: i32, %arg1: memref<16x32xf32, #tpu.memory_space<vmem>>, %arg2: memref<32x256xbf16, #tpu.memory_space<vmem>>, %arg3: memref<1x256xf32, #tpu.memory_space<vmem>>, %arg4: memref<256x96xbf16, #tpu.memory_space<vmem>>, %arg5: memref<1x96xf32, #tpu.memory_space<vmem>>, %arg6: memref<96x32xbf16, #tpu.memory_space<vmem>>, %arg7: memref<1x32xf32, #tpu.memory_space<vmem>>, %arg8: memref<16x32xf32, #tpu.memory_space<vmem>>, %arg9: memref<16x96xf32, #tpu.memory_space<vmem>>) attributes {dimension_semantics = [#tpu.dimension_semantics<parallel>], iteration_bounds = array<i64: 1>, scalar_prefetch = 0 : i64, scratch_operands = 0 : i64, tpu.core_type = #tpu.core_type<tc>, window_params = [{transform_indices = @transform_0, window_bounds = array<i64: 16, 32>}, {pipeline_mode = #tpu.pipeline_mode<synchronous>, transform_indices = @transform_1, window_bounds = array<i64: 32, 256>}, {pipeline_mode = #tpu.pipeline_mode<synchronous>, transform_indices = @transform_2, window_bounds = array<i64: 1, 256>}, {pipeline_mode = #tpu.pipeline_mode<synchronous>, transform_indices = @transform_3, window_bounds = array<i64: 256, 96>}, {pipeline_mode = #tpu.pipeline_mode<synchronous>, transform_indices = @transform_4, window_bounds = array<i64: 1, 96>}, {pipeline_mode = #tpu.pipeline_mode<synchronous>, transform_indices = @transform_5, window_bounds = array<i64: 96, 32>}, {pipeline_mode = #tpu.pipeline_mode<synchronous>, transform_indices = @transform_6, window_bounds = array<i64: 1, 32>}, {transform_indices = @transform_7, window_bounds = array<i64: 16, 32>}, {transform_indices = @transform_8, window_bounds = array<i64: 16, 96>}]} {
    %c0 = arith.constant 0 : index
    %c0_0 = arith.constant 0 : index
    %0 = vector.load %arg1[%c0, %c0_0] : memref<16x32xf32, #tpu.memory_space<vmem>>, vector<16x32xf32>
    %1 = arith.truncf %0 : vector<16x32xf32> to vector<16x32xbf16>
    %c0_1 = arith.constant 0 : index
    %c0_2 = arith.constant 0 : index
    %2 = vector.load %arg2[%c0_1, %c0_2] : memref<32x256xbf16, #tpu.memory_space<vmem>>, vector<32x256xbf16>
    %cst = arith.constant dense<0.000000e+00> : vector<16x256xf32>
    %3 = tpu.matmul %1, %2, %cst {dimension_numbers = #tpu.dot_dimension_numbers<[1], [0], [0], [1], [0, 0, 1, 1], [], []>} : vector<16x32xbf16>, vector<32x256xbf16>, vector<16x256xf32> -> vector<16x256xf32>
    %c0_3 = arith.constant 0 : index
    %c0_4 = arith.constant 0 : index
    %4 = vector.load %arg3[%c0_3, %c0_4] : memref<1x256xf32, #tpu.memory_space<vmem>>, vector<1x256xf32>
    %5 = vector.broadcast %4 : vector<1x256xf32> to vector<16x256xf32>
    %6 = arith.addf %3, %5 : vector<16x256xf32>
    %cst_5 = arith.constant 0.000000e+00 : f32
    %7 = vector.broadcast %cst_5 : f32 to vector<16x256xf32>
    %8 = arith.maximumf %6, %7 : vector<16x256xf32>
    %9 = arith.truncf %8 : vector<16x256xf32> to vector<16x256xbf16>
    %c0_6 = arith.constant 0 : index
    %c0_7 = arith.constant 0 : index
    %10 = vector.load %arg4[%c0_6, %c0_7] : memref<256x96xbf16, #tpu.memory_space<vmem>>, vector<256x96xbf16>
    %cst_8 = arith.constant dense<0.000000e+00> : vector<16x96xf32>
    %11 = tpu.matmul %9, %10, %cst_8 {dimension_numbers = #tpu.dot_dimension_numbers<[1], [0], [0], [1], [0, 0, 1, 1], [], []>} : vector<16x256xbf16>, vector<256x96xbf16>, vector<16x96xf32> -> vector<16x96xf32>
    %c0_9 = arith.constant 0 : index
    %c0_10 = arith.constant 0 : index
    %12 = vector.load %arg5[%c0_9, %c0_10] : memref<1x96xf32, #tpu.memory_space<vmem>>, vector<1x96xf32>
    %13 = vector.broadcast %12 : vector<1x96xf32> to vector<16x96xf32>
    %14 = arith.addf %11, %13 : vector<16x96xf32>
    %cst_11 = arith.constant 0.000000e+00 : f32
    %15 = vector.broadcast %cst_11 : f32 to vector<16x96xf32>
    %16 = arith.maximumf %14, %15 : vector<16x96xf32>
    %c0_12 = arith.constant 0 : index
    %c0_13 = arith.constant 0 : index
    %17 = vector.load %arg9[%c0_12, %c0_13] : memref<16x96xf32, #tpu.memory_space<vmem>>, vector<16x96xf32>
    tpu.vector_store %arg9[%c0_12, %c0_13], %16 {strides = array<i32>} : memref<16x96xf32, #tpu.memory_space<vmem>>, vector<16x96xf32>,
    %18 = arith.truncf %16 : vector<16x96xf32> to vector<16x96xbf16>
    %c0_14 = arith.constant 0 : index
    %c0_15 = arith.constant 0 : index
    %19 = vector.load %arg6[%c0_14, %c0_15] : memref<96x32xbf16, #tpu.memory_space<vmem>>, vector<96x32xbf16>
    %cst_16 = arith.constant dense<0.000000e+00> : vector<16x32xf32>
    %20 = tpu.matmul %18, %19, %cst_16 {dimension_numbers = #tpu.dot_dimension_numbers<[1], [0], [0], [1], [0, 0, 1, 1], [], []>} : vector<16x96xbf16>, vector<96x32xbf16>, vector<16x32xf32> -> vector<16x32xf32>
    %c0_17 = arith.constant 0 : index
    %c0_18 = arith.constant 0 : index
    %21 = vector.load %arg7[%c0_17, %c0_18] : memref<1x32xf32, #tpu.memory_space<vmem>>, vector<1x32xf32>
    %22 = vector.broadcast %21 : vector<1x32xf32> to vector<16x32xf32>
    %23 = arith.addf %20, %22 : vector<16x32xf32>
    %c0_19 = arith.constant 0 : index
    %c0_20 = arith.constant 0 : index
    %24 = vector.load %arg8[%c0_19, %c0_20] : memref<16x32xf32, #tpu.memory_space<vmem>>, vector<16x32xf32>
    tpu.vector_store %arg8[%c0_19, %c0_20], %23 {strides = array<i32>} : memref<16x32xf32, #tpu.memory_space<vmem>>, vector<16x32xf32>,
    return
  }
  func.func @transform_0(%arg0: i32) -> (i32, i32) {
    %c0_i32 = arith.constant 0 : i32
    %c0_i32_0 = arith.constant 0 : i32
    return %arg0, %c0_i32 : i32, i32
  }
  func.func @transform_1(%arg0: i32) -> (i32, i32) {
    %c0_i32 = arith.constant 0 : i32
    %c0_i32_0 = arith.constant 0 : i32
    %c0_i32_1 = arith.constant 0 : i32
    return %c0_i32, %c0_i32_0 : i32, i32
  }
  func.func @transform_2(%arg0: i32) -> (i32, i32) {
    %c0_i32 = arith.constant 0 : i32
    %c0_i32_0 = arith.constant 0 : i32
    %c0_i32_1 = arith.constant 0 : i32
    return %c0_i32, %c0_i32_0 : i32, i32
  }
  func.func @transform_3(%arg0: i32) -> (i32, i32) {
    %c0_i32 = arith.constant 0 : i32
    %c0_i32_0 = arith.constant 0 : i32
    %c0_i32_1 = arith.constant 0 : i32
    return %c0_i32, %c0_i32_0 : i32, i32
  }
  func.func @transform_4(%arg0: i32) -> (i32, i32) {
    %c0_i32 = arith.constant 0 : i32
    %c0_i32_0 = arith.constant 0 : i32
    %c0_i32_1 = arith.constant 0 : i32
    return %c0_i32, %c0_i32_0 : i32, i32
  }
  func.func @transform_5(%arg0: i32) -> (i32, i32) {
    %c0_i32 = arith.constant 0 : i32
    %c0_i32_0 = arith.constant 0 : i32
    %c0_i32_1 = arith.constant 0 : i32
    return %c0_i32, %c0_i32_0 : i32, i32
  }
  func.func @transform_6(%arg0: i32) -> (i32, i32) {
    %c0_i32 = arith.constant 0 : i32
    %c0_i32_0 = arith.constant 0 : i32
    %c0_i32_1 = arith.constant 0 : i32
    return %c0_i32, %c0_i32_0 : i32, i32
  }
  func.func @transform_7(%arg0: i32) -> (i32, i32) {
    %c0_i32 = arith.constant 0 : i32
    %c0_i32_0 = arith.constant 0 : i32
    return %arg0, %c0_i32 : i32, i32
  }
  func.func @transform_8(%arg0: i32) -> (i32, i32) {
    %c0_i32 = arith.constant 0 : i32
    %c0_i32_0 = arith.constant 0 : i32
    return %arg0, %c0_i32 : i32, i32
  }
}

</mosaic_0001>

<bundles_post_ra>
// kernel: tpu_custom_call.1
= control target key start
LH: loop header
LB: loop body
LE: loop exit
PB: predicated region body
PF: predicated region fallthrough
CT: control target
= control target key end

     0   :  { %14 = vsyncpa [#allocation3], 0  ;;  %v592_v2 = vmov 0   ;;  %vm70_vm0 = vcmask 261120   ;;  %s746_s0 = inlined_call_operand.vmem [shape: f32[16,32], index: 0, kind: input, shape index: {}]   ;;  %s747_s1 = inlined_call_operand.vmem [shape: bf16[32,256], index: 1, kind: input, shape index: {}]   ;;  %s748_s2 = inlined_call_operand.vmem [shape: f32[1,256], index: 2, kind: input, shape index: {}]   ;;  %s749_s3 = inlined_call_operand.vmem [shape: bf16[256,96], index: 3, kind: input, shape index: {}]   ;;  %s750_s4 = inlined_call_operand.vmem [shape: f32[1,96], index: 4, kind: input, shape index: {}]   ;;  %s751_s5 = inlined_call_operand.vmem [shape: bf16[96,32], index: 5, kind: input, shape index: {}]   ;;  %s752_s6 = inlined_call_operand.vmem [shape: f32[1,32], index: 6, kind: input, shape index: {}]   ;;  %s753_s7 = inlined_call_operand.hbm [shape: f32[16,32], index: 7, kind: output, shape index: {0}]   ;;  %s754_s8 = inlined_call_operand.hbm [shape: f32[16,96], index: 8, kind: output, shape index: {1}]  }
   0x1   :  { %v520_v0 = vld [vmem:[%s747_s1 + $0x14] ss:$8 sps:$4 sm:$0xff]   ;;  %v522_v1 = vld [vmem:[%s747_s1 + $0x10] ss:$8 sps:$4 sm:$0xff]   ;;  %106 = vmatprep.mubr.bf16.mxu0 %v592_v2  ;;  %v523_v3 = vld [vmem:[%s747_s1 + $0x4] ss:$8 sps:$4 sm:$0xff]  }
   0x2   :  { %86 = vmatprep.subr.bf16.mxu0 %v520_v0  ;;  %v525_v4 = vld [vmem:[%s747_s1] ss:$8 sps:$4 sm:$0xff]   ;;  %v526_v7 = vld [vmem:[%s749_s3 + $0x78] sm:$0xff]   ;;  %v528_v10 = vld [vmem:[%s749_s3 + $0x70] sm:$0xff]  }
   0x3   :  { %v31_v5 = vld [vmem:[%s746_s0] sm:$0xff]  ;;  %87 = vmatpush1.bf16.msra.mxu0 %v522_v1  ;;  %v32_v6 = vld [vmem:[%s746_s0 + $0x8] sm:$0xff]  ;;  %v527_v8 = vld [vmem:[%s749_s3 + $0x38] sm:$0xff]   ;;  %468 = vmatprep.subr.bf16.mxu1 %v526_v7 }
   0x4   :  { %88 = vmatprep.subr.bf16.mxu0 %v523_v3  ;;  %v33_v9 = vpack.c.bf16 %v32_v6, %v31_v5  ;;  %469 = vmatpush3.bf16.msra.mxu1 %v527_v8  ;;  %v529_v11 = vld [vmem:[%s749_s3 + $0x30] sm:$0xff]   ;;  %v530_v12 = vld [vmem:[%s749_s3 + $0x68] sm:$0xff]   ;;  %v532_v14 = vld [vmem:[%s749_s3 + $0x60] sm:$0xff]  }
   0x5   :  { %470 = vmatprep.subr.bf16.mxu1 %v528_v10  ;;  %v531_v13 = vld [vmem:[%s749_s3 + $0x28] sm:$0xff]   ;;  %v533_v15 = vld [vmem:[%s749_s3 + $0x20] sm:$0xff]   ;;  %v534_v16 = vld [vmem:[%s749_s3 + $0x58] sm:$0xff]  }
   0x6   :  { %v535_v17 = vld [vmem:[%s749_s3 + $0x18] sm:$0xff]  }
   0x7   :  { %89 = vmatpush1.bf16.msra.mxu0 %v525_v4 }
   0x8   :  { %471 = vmatpush3.bf16.msra.mxu1 %v529_v11 }
   0x9   :  { %472 = vmatprep.subr.bf16.mxu1 %v530_v12 }
   0xa   :  { %442 = vmatmul.mubr.msk.bf16.vlgmr.msra.gmra.mxu0 %vm70_vm0, %v33_v9 }
   0xc   :  { %473 = vmatpush3.bf16.msra.mxu1 %v531_v13 }
   0xd   :  { %474 = vmatprep.subr.bf16.mxu1 %v532_v14 }
  0x10   :  { %475 = vmatpush3.bf16.msra.mxu1 %v533_v15 }
  0x11   :  { %476 = vmatprep.subr.bf16.mxu1 %v534_v16 }
  0x12   :  { %15 = vsyncpa [#allocation5], 0  ;;  %v536_v18 = vld [vmem:[%s749_s3 + $0x50] sm:$0xff]   ;;  %v538_v20 = vld [vmem:[%s749_s3 + $0x48] sm:$0xff]   ;;  %v593_v25 = vmov 0.0   ;;  %v40_v27 = vlaneseq  ;;  %vm594_vm1 = vmmov 0  }
  0x13   :  { %v537_v19 = vld [vmem:[%s749_s3 + $0x10] sm:$0xff]   ;;  %v539_v21 = vld [vmem:[%s749_s3 + $0x8] sm:$0xff]   ;;  %v540_v22 = vld [vmem:[%s749_s3 + $0x40] sm:$0xff]   ;;  %497 = vmatprep.subr.bf16.mxu0 %v593_v25  ;;  %509 = vmatprep.mubr.msk.bf16.mxu0 %vm594_vm1, %v593_v25  ;;  %vm301_vm2 = vcmask 785408  }
  0x14   :  { %477 = vmatpush3.bf16.msra.mxu1 %v535_v17  ;;  %v541_v23 = vld [vmem:[%s749_s3] sm:$0xff]   ;;  %v542_v24 = vld [vmem:[%s751_s5 + $0x28] sm:$0xff]   ;;  %v41_v28 = vshrl.u32 %v40_v27, 7  ;;  %v544_v48 = vld [vmem:[%s751_s5 + $0x18] sm:$0xff]  }
  0x15   :  { %478 = vmatprep.subr.bf16.mxu1 %v536_v18  ;;  %498 = vmatpush3.bf16.msra.mxu0 %v542_v24  ;;  %v543_v26 = vld [vmem:[%s751_s5 + $0x20] sm:$0xff]   ;;  %v545_v49 = vld [vmem:[%s751_s5 + $0x10] sm:$0xff]   ;;  %v546_v50 = vld [vmem:[%s751_s5 + $0x8] sm:$0xff]  }
  0x16   :  { %499 = vmatprep.subr.bf16.mxu0 %v593_v25  ;;  %v46_v29 = vsub.s32 1, %v41_v28  ;;  %v42_v30 = vsub.s32 0, %v41_v28  ;;  %v38_v31 = vld [vmem:[%s748_s2] sm:$0x3] }
  0x17   :  { %v547_v51 = vld [vmem:[%s751_s5] sm:$0xff]   ;;  %s595_s5 = smov [#allocation4]  }
  0x18   :  { %479 = vmatpush3.bf16.msra.mxu1 %v537_v19  ;;  %v47_v33 = vrot.slane %v38_v31, %v46_v29  ;;  %v43_v34 = vrot.slane %v38_v31, %v42_v30  ;;  %v443_v53 = vld [vmem:[%s750_s4] ss:$0 sm:$0xff]  ;;  %s423_s15 = sshll.u32 %s595_s5, 4  ;;  %s424_s15 = int_to_ptr.vmem [resolvable:$true] %s423_s15 }
  0x19   :  { %480 = vmatprep.subr.bf16.mxu1 %v538_v20  ;;  %500 = vmatpush3.bf16.msra.mxu0 %v543_v26  ;;  %s548_s16 = scalar_lea.vmem %s424_s15, 256  ;;  %p553_p1 = scmp.lt.s32.totalorder %s424_s15, %s424_s15 }
  0x1a   :  { %501 = vmatprep.subr.bf16.mxu0 %v593_v25  ;;  %p549_p0 = scmp.ne.s32.totalorder %s424_s15, %s548_s16  ;;  %p554_p2 = scmp.lt.s32.totalorder %s548_s16, %s548_s16 }
  0x1c   :  { %481 = vmatpush3.bf16.msra.mxu1 %v539_v21  ;;  %p555_p3 = por %p554_p2, %p553_p1 }
  0x1d   :  { %482 = vmatprep.subr.bf16.mxu1 %v540_v22  ;;  %502 = vmatpush3.bf16.msra.mxu0 %v544_v48 }
  0x1e   :  { %503 = vmatprep.subr.bf16.mxu0 %v593_v25  ;;  %p556_p4 = pnand %p555_p3, %p549_p0 }
  0x20   :  { %483 = vmatpush3.bf16.msra.mxu1 %v541_v23 }
  0x21   :  { %504 = vmatpush3.bf16.msra.mxu0 %v545_v49 }
  0x22   :  { %505 = vmatprep.subr.bf16.mxu0 %v593_v25 }
  0x25   :  { %506 = vmatpush3.bf16.msra.mxu0 %v546_v50 }
  0x26   :  { %507 = vmatprep.subr.bf16.mxu0 %v593_v25 }
  0x29   :  { %508 = vmatpush3.bf16.msra.mxu0 %v547_v51 }
  0xca   :  { %v108_v32 = vpop.f32.mrf.mxu0 }
  0xcb   :  { %v109_v39 = vadd.f32 %v108_v32, %v43_v34 }
  0xcc   :  { %v110_v35 = vpop.f32.mrf.mxu0 }
  0xcd   :  { %v111_v37 = vadd.f32 %v110_v35, %v47_v33  ;;  %v117_v45 = vmax.f32 %v109_v39, 0.0 }
  0xce   :  { %v112_v36 = vpop.f32.mrf.mxu0 }
  0xcf   :  { %v113_v38 = vadd.f32 %v112_v36, %v43_v34  ;;  %v118_v43 = vmax.f32 %v111_v37, 0.0 }
  0xd0   :  { %v114_v40 = vpop.f32.mrf.mxu0 }
  0xd1   :  { %v115_v41 = vadd.f32 %v114_v40, %v47_v33  ;;  %v119_v42 = vmax.f32 %v113_v38, 0.0 }
  0xd3   :  { %v120_v44 = vmax.f32 %v115_v41, 0.0  ;;  %v121_v47 = vpack.c.bf16 %v119_v42, %v117_v45 }
  0xd5   :  { %v122_v46 = vpack.c.bf16 %v120_v44, %v118_v43 }
  0xd7   :  { %290 = vmatprep.mubr.bf16.mxu1 %v122_v46 }
  0xd8   :  { %291 = vmatmul.mubr.bf16.vlgmr.msra.gmra.mxu1 %v121_v47 }
 0x198   :  { %v484_v52 = vpop.f32.mrf.mxu1 }
 0x19a   :  { %v485_v54 = vpop.f32.mrf.mxu1 }
 0x19b   :  { %v486_v55 = vadd.f32 %v485_v54, %v484_v52 }
 0x19c   :  { %v487_v56 = vpop.f32.mrf.mxu1 }
 0x19d   :  { %v293_v57 = vadd.f32 %v486_v55, %v443_v53 }
 0x19e   :  { %v488_v58 = vpop.f32.mrf.mxu1 }
 0x19f   :  { %v299_v59 = vmax.f32 %v293_v57, 0.0  ;;  %v489_v60 = vadd.f32 %v488_v58, %v487_v56 }
 0x1a1   :  { %302 = vst.msk [vmem:[#allocation4] sm:$0xff] %vm301_vm2, %v299_v59  ;;  %v296_v61 = vadd.f32 %v489_v60, %v443_v53 }
 0x1a3   :  { %v300_v62 = vmax.f32 %v296_v61, 0.0 }
 0x1a5   :  { %303 = vst.msk [vmem:[#allocation4 + $0x8] sm:$0xff] %vm301_vm2, %v300_v62  ;;  %v304_v63 = vpack.c.bf16 %v300_v62, %v299_v59 }
 0x1a7   :  { %510 = vmatmul.mubr.msk.bf16.vlgmr.msra.gmra.mxu0 %vm301_vm2, %v304_v63 }
 0x1a8   :  { %559 = shalt.err (!%p556_p4)
}
 0x1a9   :  { %s596_s4 = smov 128   ;;  %s597_s17 = smov 8   ;;  %v460_v0 = vld [vmem:[%s752_s6] ss:$0 sm:$0xff] }
 0x1aa   :  { %429 = dma.vmem_to_hbm [thread:$0]  %s424_s15, 256, %s754_s8, [#allocation5], %s596_s4, %s596_s4, %s597_s17  }
 0x1ab   :  { %s598_s21 = smov [#allocation2]  }
 0x1ac   :  { %s411_s22 = sshll.u32 %s598_s21, 4  ;;  %s412_s22 = int_to_ptr.vmem [resolvable:$true] %s411_s22 }
 0x1ad   :  { %s568_s0 = scalar_lea.vmem %s412_s22, 256  ;;  %p573_p6 = scmp.lt.s32.totalorder %s412_s22, %s412_s22 }
 0x1ae   :  { %p569_p5 = scmp.ne.s32.totalorder %s412_s22, %s568_s0  ;;  %p574_p7 = scmp.lt.s32.totalorder %s568_s0, %s568_s0 }
 0x1b0   :  { %p575_p8 = por %p574_p7, %p573_p6 }
 0x1b2   :  { %p576_p9 = pnand %p575_p8, %p569_p5 }
 0x267   :  { %v397_v1 = vpop.f32.mrf.mxu0 }
 0x268   :  { %v398_v2 = vadd.f32 %v460_v0, %v397_v1 }
 0x269   :  { %v511_v3 = vpop.f32.mrf.mxu0 }
 0x26a   :  { %404 = vst.msk [vmem:[#allocation2] sm:$0xff] %vm70_vm0, %v398_v2 }
 0x26b   :  { %v400_v4 = vpop.f32.mrf.mxu0 }
 0x26c   :  { %v401_v5 = vadd.f32 %v460_v0, %v400_v4 }
 0x26d   :  { %v512_v6 = vpop.f32.mrf.mxu0 }
 0x26e   :  { %405 = vst.msk [vmem:[#allocation2 + $0x8] sm:$0xff] %vm70_vm0, %v401_v5 }
 0x26f   :  { %579 = shalt.err (!%p576_p9)
}
 0x270   :  { %417 = dma.vmem_to_hbm [thread:$0]  %s412_s22, 256, %s753_s7, [#allocation3], %s596_s4, %s596_s4, %s597_s17  }
 0x271   :  { %588 = dma.done.wait [#allocation3], 256  }
 0x272   :  { %589 = vsyncadd [#allocation3], 4294967040 }
 0x273   :  { %590 = dma.done.wait [#allocation5], 256  }
 0x274   :  { %591 = vsyncadd [#allocation5], 4294967040 }
 0x275   :  { %436 = vsyncpa [#allocation3], 1 }
 0x276   :  { %437 = vsyncpa [#allocation5], 1 }

</bundles_post_ra>
